<compile_context>
chip_gen: v6e
topology: v6e:2x2x1
jax: 0.10.0
libtpu: 0.0.40
codegen_flags: <defaults>
</compile_context>

<pallas_src>
import functools
import math

import jax
import jax.numpy as jnp
from jax.experimental import pallas as pl
from jax.experimental.pallas import tpu as pltpu


def _gfpn_level_kernel(xo_ref, xh_ref, w1_ref, b1_ref, w3_ref, cmask_ref,
                       shift_ref, o_ref, t_ref, *, W, TH):
    """Fused cat + 1x1 conv(+bias) + 3x3 conv(pad=1) + folded BatchNorm.

    xo_ref, xh_ref : (C, (TH+2)*W)  halo-extended input window (f32, NCHW-flat)
    w1_ref         : (C, 2C)        1x1 weight, bf16, columns = [origin | h]
    b1_ref         : (C, 1)         1x1 bias (f32 column)
    w3_ref         : (3, C, 3C)     3x3 taps grouped by dx (BN scale folded), bf16
    cmask_ref      : (2, TH*W)      column validity masks for dx = -1 / +1
    shift_ref      : (C, 1)         BN shift = beta - scale * running_mean
    o_ref          : (C, TH*W)      output tile (NCHW-flat)
    t_ref          : (C, (TH+2)*W)  VMEM scratch for the zero-halo intermediate
    """
    C = o_ref.shape[0]
    LW = TH * W

    # ---- fused concat + 1x1 conv (+bias): one K=2C matmul, bf16 MXU operands ----
    x_cat = jnp.concatenate([xo_ref[...], xh_ref[...]], axis=0)        # (2C, Lw)
    t_ref[...] = (jnp.dot(w1_ref[...], x_cat.astype(jnp.bfloat16),
                          preferred_element_type=jnp.float32)
                  + b1_ref[...])                                       # (C, Lw) f32

    # ---- zero-halo: halo rows outside the image are the 3x3 "same" padding ----
    ti = pl.program_id(1)

    @pl.when(ti == 0)
    def _():
        t_ref[:, :W] = jnp.zeros((C, W), jnp.float32)

    @pl.when(ti == pl.num_programs(1) - 1)
    def _():
        t_ref[:, (TH + 1) * W:] = jnp.zeros((C, W), jnp.float32)

    # ---- 3x3 conv (+ folded BN scale): 3 dots with K=3C.                     ----
    # dy = -1/0/+1 come from static lane slices of the halo scratch; dx = +-1 are
    # two lane rolls; the column masks are applied after the contraction (they
    # broadcast over channels, so they commute with the channel sum).
    t_full = t_ref[...]                                                # (C, (TH+2)*W)
    s_cat = jnp.concatenate(
        [t_full[:, 0:LW],                 # dy = -1
         t_full[:, W:W + LW],             # dy =  0
         t_full[:, 2 * W:]],              # dy = +1
        axis=0)                                                        # (3C, LW) f32

    s0 = s_cat.astype(jnp.bfloat16)
    sl = jnp.roll(s_cat, 1, axis=1).astype(jnp.bfloat16)               # operand[p] = s[p-1]
    sr = jnp.roll(s_cat, -1, axis=1).astype(jnp.bfloat16)              # operand[p] = s[p+1]

    cm = cmask_ref[...]                                                # (2, LW)
    acc = jnp.dot(w3_ref[1], s0, preferred_element_type=jnp.float32)               # dx =  0
    acc = acc + jnp.dot(w3_ref[0], sl, preferred_element_type=jnp.float32) * cm[0:1]  # dx = -1
    acc = acc + jnp.dot(w3_ref[2], sr, preferred_element_type=jnp.float32) * cm[1:2]  # dx = +1

    # ---- BN shift + store (lane-dense output block) ----
    o_ref[...] = (acc + shift_ref[...]).astype(o_ref.dtype)


def _vmem_capacity_bytes():
    try:
        return int(pltpu.get_tpu_info().vmem_capacity_bytes)
    except Exception:
        return 64 * 1024 * 1024          # conservative: v7x VMEM per TensorCore


def _pick_tile_h(H, W, C, vmem_bytes):
    """Largest H-tile fitting the per-generation VMEM budget.

    Constraints: TH | H, and TH*W % 128 == 0 unless TH == H (lane-dense output
    blocks and the (8,128) BlockSpec rule).
    """
    lane_step = 128 // math.gcd(W, 128)
    cands = [d for d in range(1, H + 1)
             if H % d == 0 and (d == H or d % lane_step == 0)]
    # ~14 f32 (C, W)-row equivalents live per tile row: double-buffered
    # origin/h/out blocks, the f32 halo scratch and the matmul temporaries.
    bytes_per_row = C * W * 4 * 14
    th_max = max(1, int(vmem_bytes * 0.35) // bytes_per_row)
    fits = [d for d in cands if d <= th_max]
    return max(fits) if fits else min(cands)


@functools.partial(jax.jit, static_argnames=("tile_h", "vmem_limit"))
def _gfpn_level(x_o, x_h, w1_bf, b1_col, w3_dx, shift_col, *, tile_h, vmem_limit):
    N, C, H, W = x_o.shape
    TH = tile_h
    T = H // TH
    LW = TH * W
    Lw = (TH + 2) * W

    # NCHW -> (N, C, H*W) is free; pad one zero row top/bottom, then build the
    # halo-extended, H-tiled windows (N, T, C, (TH+2)*W).
    xo_p = jnp.pad(x_o.reshape(N, C, H * W), ((0, 0), (0, 0), (W, W)))
    xh_p = jnp.pad(x_h.reshape(N, C, H * W), ((0, 0), (0, 0), (W, W)))
    if T == 1:
        xo_w = xo_p[:, None]
        xh_w = xh_p[:, None]
    else:
        idx = (jnp.arange(T) * LW)[:, None] + jnp.arange(Lw)[None, :]   # (T, Lw)
        xo_w = jnp.transpose(xo_p[:, :, idx], (0, 2, 1, 3))
        xh_w = jnp.transpose(xh_p[:, :, idx], (0, 2, 1, 3))

    # Column masks for the dx = -1 / +1 taps (constants under jit).
    xcol = jnp.arange(LW, dtype=jnp.int32) % W
    cmask = jnp.stack([xcol > 0, xcol < W - 1]).astype(jnp.float32)     # (2, LW)

    out = pl.pallas_call(
        functools.partial(_gfpn_level_kernel, W=W, TH=TH),
        out_shape=jax.ShapeDtypeStruct((N, C, H * W), x_o.dtype),
        grid_spec=pltpu.PrefetchScalarGridSpec(
            num_scalar_prefetch=0,
            grid=(N, T),
            in_specs=[
                pl.BlockSpec((None, None, C, Lw), lambda n, i: (n, i, 0, 0)),  # origin win
                pl.BlockSpec((None, None, C, Lw), lambda n, i: (n, i, 0, 0)),  # h win
                pl.BlockSpec((C, 2 * C), lambda n, i: (0, 0)),                 # 1x1 W (bf16)
                pl.BlockSpec((C, 1), lambda n, i: (0, 0)),                     # 1x1 bias
                pl.BlockSpec((3, C, 3 * C), lambda n, i: (0, 0, 0)),           # 3x3 taps (bf16)
                pl.BlockSpec((2, LW), lambda n, i: (0, 0)),                    # column masks
                pl.BlockSpec((C, 1), lambda n, i: (0, 0)),                     # BN shift
            ],
            out_specs=pl.BlockSpec((None, C, LW), lambda n, i: (n, 0, i)),
            scratch_shapes=[pltpu.VMEM((C, Lw), jnp.float32)],
        ),
        compiler_params=pltpu.CompilerParams(
            # batch axis + H-tile axis both parallel (v7x dual-TensorCore).
            dimension_semantics=("parallel", "parallel"),
            vmem_limit_bytes=vmem_limit,
        ),
    )(xo_w, xh_w, w1_bf, b1_col, w3_dx, cmask, shift_col)
    return out.reshape(N, C, H, W)        # already NCHW; reshape is free


def gfpn_conv_forward(origin, h, params, tile_h=None):
    """Pallas port of GFPN_conv.forward over lists of NCHW feature maps."""
    w1 = params["conv_1_weight"]          # (F, 2F, 1, 1)
    b1 = params["conv_1_bias"]            # (F,)
    w3 = params["conv_weight"]            # (F, F, 3, 3)
    gamma = params["bn_weight"]
    beta = params["bn_bias"]
    mean = params["bn_running_mean"]
    var = params["bn_running_var"]
    eps = params.get("bn_eps", 1e-5)

    C = w1.shape[0]
    # 1x1 weight: columns ordered [origin-channels | h-channels] (cat order).
    w1_bf = w1.reshape(C, 2 * C).astype(jnp.bfloat16)
    b1_col = b1.reshape(C, 1).astype(jnp.float32)

    # Fold BN (eval mode) into the 3x3 conv: per-output-channel scale + shift.
    scale = gamma / jnp.sqrt(var + eps)                                 # (F,)
    w3f = w3 * scale[:, None, None, None]                               # (O, I, KH, KW)
    # (KW, O, KH*I): one K=3C dot per dx tap group; kh blocks match the dy
    # ordering (-1, 0, +1) of the concatenated operand in the kernel.
    w3_dx = jnp.transpose(w3f, (3, 0, 2, 1)).reshape(3, C, 3 * C).astype(jnp.bfloat16)
    shift_col = (beta - scale * mean).reshape(C, 1).astype(jnp.float32)

    vmem_cap = _vmem_capacity_bytes()
    vmem_limit = min(int(vmem_cap * 0.75), 96 * 1024 * 1024)

    outs = []
    for o_f, h_f in zip(origin, h):
        N, C_, H, W = o_f.shape
        assert C_ == C
        th = tile_h if tile_h is not None else _pick_tile_h(H, W, C, vmem_cap)
        th = min(th, H)
        assert H % th == 0 and (th == H or (th * W) % 128 == 0), (
            f"invalid tile_h={th} for H={H}, W={W}")
        outs.append(_gfpn_level(o_f, h_f, w1_bf, b1_col, w3_dx, shift_col,
                                tile_h=th, vmem_limit=vmem_limit))
    return outs


if __name__ == "__main__":
    feat_size = 4
    N = 2
    key = jax.random.PRNGKey(0)
    keys = jax.random.split(key, 11)

    # Two FPN levels (the module maps the same convs over a list of levels).
    level_shapes = [(N, feat_size, 16, 16), (N, feat_size, 8, 8)]
    origin = [jax.random.normal(keys[i], s, dtype=jnp.float32)
              for i, s in enumerate(level_shapes)]
    h = [jax.random.normal(keys[2 + i], s, dtype=jnp.float32)
         for i, s in enumerate(level_shapes)]

    params = {
        "conv_1_weight": 0.1 * jax.random.normal(
            keys[4], (feat_size, 2 * feat_size, 1, 1), dtype=jnp.float32),
        "conv_1_bias": 0.1 * jax.random.normal(
            keys[5], (feat_size,), dtype=jnp.float32),
        "conv_weight": 0.1 * jax.random.normal(
            keys[6], (feat_size, feat_size, 3, 3), dtype=jnp.float32),
        "bn_weight": 1.0 + 0.1 * jax.random.normal(
            keys[7], (feat_size,), dtype=jnp.float32),
        "bn_bias": 0.1 * jax.random.normal(
            keys[8], (feat_size,), dtype=jnp.float32),
        "bn_running_mean": 0.1 * jax.random.normal(
            keys[9], (feat_size,), dtype=jnp.float32),
        "bn_running_var": 0.5 + jax.random.uniform(
            keys[10], (feat_size,), dtype=jnp.float32),
        "bn_eps": 1e-5,
    }

    # ---- pure-JAX reference (same math as the PyTorch module, BN eval mode) ----
    def reference_level(o_f, h_f):
        dn = ("NCHW", "OIHW", "NCHW")
        feat = jnp.concatenate([o_f, h_f], axis=1)
        out = jax.lax.conv_general_dilated(
            feat, params["conv_1_weight"], (1, 1), "VALID",
            dimension_numbers=dn, precision=jax.lax.Precision.HIGHEST)
        out = out + params["conv_1_bias"].reshape(1, -1, 1, 1)
        out = jax.lax.conv_general_dilated(
            out, params["conv_weight"], (1, 1), "SAME",
            dimension_numbers=dn, precision=jax.lax.Precision.HIGHEST)
        inv = jax.lax.rsqrt(params["bn_running_var"] + params["bn_eps"])
        sc = (params["bn_weight"] * inv).reshape(1, -1, 1, 1)
        return ((out - params["bn_running_mean"].reshape(1, -1, 1, 1)) * sc
                + params["bn_bias"].reshape(1, -1, 1, 1))

    refs = [reference_level(o_f, h_f) for o_f, h_f in zip(origin, h)]

    # 1) auto tile selection (whole image per step at these small sizes).
    outs_auto = jax.block_until_ready(gfpn_conv_forward(origin, h, params))
    # 2) forced tile_h=8 -> exercises the multi-tile halo path on the 16x16 level.
    outs_tiled = jax.block_until_ready(gfpn_conv_forward(origin, h, params, tile_h=8))

    for outs in (outs_auto, outs_tiled):
        for y, ref in zip(outs, refs):
            assert y.shape == ref.shape
            # Tolerance accounts for bf16 MXU operands vs. the f32 HIGHEST reference.
            assert jnp.allclose(y, ref, atol=2e-2, rtol=1e-2), (
                float(jnp.max(jnp.abs(y - ref))))

    print("KERNEL_OK")
</pallas_src>

<mosaic_0001>
module attributes {stable_mosaic.version = 11 : i64} {
  func.func @_gfpn_level_kernel(%arg0: i32, %arg1: i32, %arg2: memref<1x1x4x288xf32, #tpu.memory_space<vmem>>, %arg3: memref<1x1x4x288xf32, #tpu.memory_space<vmem>>, %arg4: memref<4x8xbf16, #tpu.memory_space<vmem>>, %arg5: memref<4x1xf32, #tpu.memory_space<vmem>>, %arg6: memref<3x4x12xbf16, #tpu.memory_space<vmem>>, %arg7: memref<2x256xf32, #tpu.memory_space<vmem>>, %arg8: memref<4x1xf32, #tpu.memory_space<vmem>>, %arg9: memref<1x4x256xf32, #tpu.memory_space<vmem>>, %arg10: memref<4x288xf32, #tpu.memory_space<vmem>>) attributes {dimension_semantics = [#tpu.dimension_semantics<parallel>, #tpu.dimension_semantics<parallel>], iteration_bounds = array<i64: 2, 1>, scalar_prefetch = 0 : i64, scratch_operands = 1 : i64, tpu.core_type = #tpu.core_type<tc>, window_params = [{transform_indices = @transform_0, window_bounds = array<i64: 1, 1, 4, 288>}, {transform_indices = @transform_1, window_bounds = array<i64: 1, 1, 4, 288>}, {pipeline_mode = #tpu.pipeline_mode<synchronous>, transform_indices = @transform_2, window_bounds = array<i64: 4, 8>}, {pipeline_mode = #tpu.pipeline_mode<synchronous>, transform_indices = @transform_3, window_bounds = array<i64: 4, 1>}, {pipeline_mode = #tpu.pipeline_mode<synchronous>, transform_indices = @transform_4, window_bounds = array<i64: 3, 4, 12>}, {pipeline_mode = #tpu.pipeline_mode<synchronous>, transform_indices = @transform_5, window_bounds = array<i64: 2, 256>}, {pipeline_mode = #tpu.pipeline_mode<synchronous>, transform_indices = @transform_6, window_bounds = array<i64: 4, 1>}, {transform_indices = @transform_7, window_bounds = array<i64: 1, 4, 256>}]} {
    %c0 = arith.constant 0 : index
    %c0_0 = arith.constant 0 : index
    %c0_1 = arith.constant 0 : index
    %c0_2 = arith.constant 0 : index
    %0 = vector.load %arg2[%c0, %c0_0, %c0_1, %c0_2] : memref<1x1x4x288xf32, #tpu.memory_space<vmem>>, vector<1x1x4x288xf32>
    %1 = vector.shape_cast %0 : vector<1x1x4x288xf32> to vector<4x288xf32>
    %c0_3 = arith.constant 0 : index
    %c0_4 = arith.constant 0 : index
    %c0_5 = arith.constant 0 : index
    %c0_6 = arith.constant 0 : index
    %2 = vector.load %arg3[%c0_3, %c0_4, %c0_5, %c0_6] : memref<1x1x4x288xf32, #tpu.memory_space<vmem>>, vector<1x1x4x288xf32>
    %3 = vector.shape_cast %2 : vector<1x1x4x288xf32> to vector<4x288xf32>
    %4 = tpu.concatenate %1, %3 in 0 : vector<4x288xf32>, vector<4x288xf32> -> vector<8x288xf32>
    %c0_7 = arith.constant 0 : index
    %c0_8 = arith.constant 0 : index
    %5 = vector.load %arg4[%c0_7, %c0_8] : memref<4x8xbf16, #tpu.memory_space<vmem>>, vector<4x8xbf16>
    %6 = arith.truncf %4 : vector<8x288xf32> to vector<8x288xbf16>
    %cst = arith.constant dense<0.000000e+00> : vector<4x288xf32>
    %7 = tpu.matmul %5, %6, %cst {dimension_numbers = #tpu.dot_dimension_numbers<[1], [0], [0], [1], [0, 0, 1, 1], [], []>} : vector<4x8xbf16>, vector<8x288xbf16>, vector<4x288xf32> -> vector<4x288xf32>
    %c0_9 = arith.constant 0 : index
    %c0_10 = arith.constant 0 : index
    %8 = vector.load %arg5[%c0_9, %c0_10] : memref<4x1xf32, #tpu.memory_space<vmem>>, vector<4x1xf32>
    %9 = vector.broadcast %8 : vector<4x1xf32> to vector<4x288xf32>
    %10 = arith.addf %7, %9 : vector<4x288xf32>
    %c0_11 = arith.constant 0 : index
    %c0_12 = arith.constant 0 : index
    %11 = vector.load %arg10[%c0_11, %c0_12] : memref<4x288xf32, #tpu.memory_space<vmem>>, vector<4x288xf32>
    tpu.vector_store %arg10[%c0_11, %c0_12], %10 {strides = array<i32>} : memref<4x288xf32, #tpu.memory_space<vmem>>, vector<4x288xf32>,
    %c0_i32 = arith.constant 0 : i32
    %12 = arith.cmpi eq, %arg1, %c0_i32 : i32
    %13 = arith.extui %12 : i1 to i32
    %c0_i32_13 = arith.constant 0 : i32
    %14 = arith.cmpi ne, %13, %c0_i32_13 : i32
    scf.if %14 {
      %cst_35 = arith.constant 0.000000e+00 : f32
      %56 = vector.broadcast %cst_35 : f32 to vector<4x16xf32>
      %c0_36 = arith.constant 0 : index
      %c0_37 = arith.constant 0 : index
      %57 = vector.load %arg10[%c0_36, %c0_37] : memref<4x288xf32, #tpu.memory_space<vmem>>, vector<4x16xf32>
      tpu.vector_store %arg10[%c0_36, %c0_37], %56 {strides = array<i32>} : memref<4x288xf32, #tpu.memory_space<vmem>>, vector<4x16xf32>,
    } else {
    }
    %c0_i32_14 = arith.constant 0 : i32
    %15 = arith.cmpi eq, %arg1, %c0_i32_14 : i32
    %16 = arith.extui %15 : i1 to i32
    %c0_i32_15 = arith.constant 0 : i32
    %17 = arith.cmpi ne, %16, %c0_i32_15 : i32
    scf.if %17 {
      %cst_35 = arith.constant 0.000000e+00 : f32
      %56 = vector.broadcast %cst_35 : f32 to vector<4x16xf32>
      %c0_36 = arith.constant 0 : index
      %c272 = arith.constant 272 : index
      %57 = vector.load %arg10[%c0_36, %c272] : memref<4x288xf32, #tpu.memory_space<vmem>>, vector<4x16xf32>
      tpu.vector_store %arg10[%c0_36, %c272], %56 {strides = array<i32>} : memref<4x288xf32, #tpu.memory_space<vmem>>, vector<4x16xf32>,
    } else {
    }
    %c0_16 = arith.constant 0 : index
    %c0_17 = arith.constant 0 : index
    %18 = vector.load %arg10[%c0_16, %c0_17] : memref<4x288xf32, #tpu.memory_space<vmem>>, vector<4x288xf32>
    %19 = vector.extract_strided_slice %18 {offsets = [0, 0], sizes = [4, 256], strides = [1, 1]} : vector<4x288xf32> to vector<4x256xf32>
    %20 = vector.extract_strided_slice %18 {offsets = [0, 16], sizes = [4, 256], strides = [1, 1]} : vector<4x288xf32> to vector<4x256xf32>
    %21 = vector.extract_strided_slice %18 {offsets = [0, 32], sizes = [4, 256], strides = [1, 1]} : vector<4x288xf32> to vector<4x256xf32>
    %22 = tpu.concatenate %19, %20, %21 in 0 : vector<4x256xf32>, vector<4x256xf32>, vector<4x256xf32> -> vector<12x256xf32>
    %23 = arith.truncf %22 : vector<12x256xf32> to vector<12x256xbf16>
    %24 = vector.extract_strided_slice %22 {offsets = [0, 255], sizes = [12, 1], strides = [1, 1]} : vector<12x256xf32> to vector<12x1xf32>
    %25 = vector.extract_strided_slice %22 {offsets = [0, 0], sizes = [12, 255], strides = [1, 1]} : vector<12x256xf32> to vector<12x255xf32>
    %26 = tpu.concatenate %24, %25 in 1 : vector<12x1xf32>, vector<12x255xf32> -> vector<12x256xf32>
    %27 = arith.truncf %26 : vector<12x256xf32> to vector<12x256xbf16>
    %28 = vector.extract_strided_slice %22 {offsets = [0, 1], sizes = [12, 255], strides = [1, 1]} : vector<12x256xf32> to vector<12x255xf32>
    %29 = vector.extract_strided_slice %22 {offsets = [0, 0], sizes = [12, 1], strides = [1, 1]} : vector<12x256xf32> to vector<12x1xf32>
    %30 = tpu.concatenate %28, %29 in 1 : vector<12x255xf32>, vector<12x1xf32> -> vector<12x256xf32>
    %31 = arith.truncf %30 : vector<12x256xf32> to vector<12x256xbf16>
    %c0_18 = arith.constant 0 : index
    %c0_19 = arith.constant 0 : index
    %32 = vector.load %arg7[%c0_18, %c0_19] : memref<2x256xf32, #tpu.memory_space<vmem>>, vector<2x256xf32>
    %c1 = arith.constant 1 : index
    %c0_20 = arith.constant 0 : index
    %c0_21 = arith.constant 0 : index
    %33 = vector.load %arg6[%c1, %c0_20, %c0_21] : memref<3x4x12xbf16, #tpu.memory_space<vmem>>, vector<1x4x12xbf16>
    %34 = vector.shape_cast %33 : vector<1x4x12xbf16> to vector<4x12xbf16>
    %cst_22 = arith.constant dense<0.000000e+00> : vector<4x256xf32>
    %35 = tpu.matmul %34, %23, %cst_22 {dimension_numbers = #tpu.dot_dimension_numbers<[1], [0], [0], [1], [0, 0, 1, 1], [], []>} : vector<4x12xbf16>, vector<12x256xbf16>, vector<4x256xf32> -> vector<4x256xf32>
    %c0_23 = arith.constant 0 : index
    %c0_24 = arith.constant 0 : index
    %c0_25 = arith.constant 0 : index
    %36 = vector.load %arg6[%c0_23, %c0_24, %c0_25] : memref<3x4x12xbf16, #tpu.memory_space<vmem>>, vector<1x4x12xbf16>
    %37 = vector.shape_cast %36 : vector<1x4x12xbf16> to vector<4x12xbf16>
    %cst_26 = arith.constant dense<0.000000e+00> : vector<4x256xf32>
    %38 = tpu.matmul %37, %27, %cst_26 {dimension_numbers = #tpu.dot_dimension_numbers<[1], [0], [0], [1], [0, 0, 1, 1], [], []>} : vector<4x12xbf16>, vector<12x256xbf16>, vector<4x256xf32> -> vector<4x256xf32>
    %39 = vector.extract_strided_slice %32 {offsets = [0, 0], sizes = [1, 256], strides = [1, 1]} : vector<2x256xf32> to vector<1x256xf32>
    %40 = vector.broadcast %39 : vector<1x256xf32> to vector<4x256xf32>
    %41 = arith.mulf %38, %40 : vector<4x256xf32>
    %42 = arith.addf %35, %41 : vector<4x256xf32>
    %c2 = arith.constant 2 : index
    %c0_27 = arith.constant 0 : index
    %c0_28 = arith.constant 0 : index
    %43 = vector.load %arg6[%c2, %c0_27, %c0_28] : memref<3x4x12xbf16, #tpu.memory_space<vmem>>, vector<1x4x12xbf16>
    %44 = vector.shape_cast %43 : vector<1x4x12xbf16> to vector<4x12xbf16>
    %cst_29 = arith.constant dense<0.000000e+00> : vector<4x256xf32>
    %45 = tpu.matmul %44, %31, %cst_29 {dimension_numbers = #tpu.dot_dimension_numbers<[1], [0], [0], [1], [0, 0, 1, 1], [], []>} : vector<4x12xbf16>, vector<12x256xbf16>, vector<4x256xf32> -> vector<4x256xf32>
    %46 = vector.extract_strided_slice %32 {offsets = [1, 0], sizes = [1, 256], strides = [1, 1]} : vector<2x256xf32> to vector<1x256xf32>
    %47 = vector.broadcast %46 : vector<1x256xf32> to vector<4x256xf32>
    %48 = arith.mulf %45, %47 : vector<4x256xf32>
    %49 = arith.addf %42, %48 : vector<4x256xf32>
    %c0_30 = arith.constant 0 : index
    %c0_31 = arith.constant 0 : index
    %50 = vector.load %arg8[%c0_30, %c0_31] : memref<4x1xf32, #tpu.memory_space<vmem>>, vector<4x1xf32>
    %51 = vector.broadcast %50 : vector<4x1xf32> to vector<4x256xf32>
    %52 = arith.addf %49, %51 : vector<4x256xf32>
    %c0_32 = arith.constant 0 : index
    %c0_33 = arith.constant 0 : index
    %c0_34 = arith.constant 0 : index
    %53 = vector.load %arg9[%c0_32, %c0_33, %c0_34] : memref<1x4x256xf32, #tpu.memory_space<vmem>>, vector<1x4x256xf32>
    %54 = vector.shape_cast %53 : vector<1x4x256xf32> to vector<4x256xf32>
    %55 = vector.shape_cast %52 : vector<4x256xf32> to vector<1x4x256xf32>
    tpu.vector_store %arg9[%c0_32, %c0_33, %c0_34], %55 {strides = array<i32>} : memref<1x4x256xf32, #tpu.memory_space<vmem>>, vector<1x4x256xf32>,
    return
  }
  func.func @transform_0(%arg0: i32, %arg1: i32) -> (i32, i32, i32, i32) {
    %c0_i32 = arith.constant 0 : i32
    %c0_i32_0 = arith.constant 0 : i32
    %c0_i32_1 = arith.constant 0 : i32
    return %arg0, %arg1, %c0_i32, %c0_i32_0 : i32, i32, i32, i32
  }
  func.func @transform_1(%arg0: i32, %arg1: i32) -> (i32, i32, i32, i32) {
    %c0_i32 = arith.constant 0 : i32
    %c0_i32_0 = arith.constant 0 : i32
    %c0_i32_1 = arith.constant 0 : i32
    return %arg0, %arg1, %c0_i32, %c0_i32_0 : i32, i32, i32, i32
  }
  func.func @transform_2(%arg0: i32, %arg1: i32) -> (i32, i32) {
    %c0_i32 = arith.constant 0 : i32
    %c0_i32_0 = arith.constant 0 : i32
    %c0_i32_1 = arith.constant 0 : i32
    return %c0_i32, %c0_i32_0 : i32, i32
  }
  func.func @transform_3(%arg0: i32, %arg1: i32) -> (i32, i32) {
    %c0_i32 = arith.constant 0 : i32
    %c0_i32_0 = arith.constant 0 : i32
    %c0_i32_1 = arith.constant 0 : i32
    return %c0_i32, %c0_i32_0 : i32, i32
  }
  func.func @transform_4(%arg0: i32, %arg1: i32) -> (i32, i32, i32) {
    %c0_i32 = arith.constant 0 : i32
    %c0_i32_0 = arith.constant 0 : i32
    %c0_i32_1 = arith.constant 0 : i32
    %c0_i32_2 = arith.constant 0 : i32
    return %c0_i32, %c0_i32_0, %c0_i32_1 : i32, i32, i32
  }
  func.func @transform_5(%arg0: i32, %arg1: i32) -> (i32, i32) {
    %c0_i32 = arith.constant 0 : i32
    %c0_i32_0 = arith.constant 0 : i32
    %c0_i32_1 = arith.constant 0 : i32
    return %c0_i32, %c0_i32_0 : i32, i32
  }
  func.func @transform_6(%arg0: i32, %arg1: i32) -> (i32, i32) {
    %c0_i32 = arith.constant 0 : i32
    %c0_i32_0 = arith.constant 0 : i32
    %c0_i32_1 = arith.constant 0 : i32
    return %c0_i32, %c0_i32_0 : i32, i32
  }
  func.func @transform_7(%arg0: i32, %arg1: i32) -> (i32, i32, i32) {
    %c0_i32 = arith.constant 0 : i32
    %c0_i32_0 = arith.constant 0 : i32
    return %arg0, %c0_i32, %arg1 : i32, i32, i32
  }
}

</mosaic_0001>

<bundles_post_ra>
// kernel: _gfpn_level.1
= control target key start
LH: loop header
LB: loop body
LE: loop exit
PB: predicated region body
PF: predicated region fallthrough
CT: control target
= control target key end

     0   :  { %s1062_s24 = smov 0   ;;  %s1064_s25 = smov 0   ;;  %s1150_s0 = inlined_call_operand.vmem [shape: f32[2,1,4,288], index: 0, kind: input, shape index: {}]   ;;  %s1151_s1 = inlined_call_operand.vmem [shape: f32[2,1,4,288], index: 1, kind: input, shape index: {}]   ;;  %s1152_s2 = inlined_call_operand.vmem [shape: bf16[4,8], index: 2, kind: input, shape index: {}]   ;;  %s1153_s3 = inlined_call_operand.vmem [shape: f32[4,1], index: 3, kind: input, shape index: {}]   ;;  %s1154_s4 = inlined_call_operand.vmem [shape: bf16[3,4,12], index: 4, kind: input, shape index: {}]   ;;  %s1155_s5 = inlined_call_operand.vmem [shape: f32[2,256], index: 5, kind: input, shape index: {}]   ;;  %s1156_s6 = inlined_call_operand.vmem [shape: f32[4,1], index: 6, kind: input, shape index: {}]   ;;  %s1157_s7 = inlined_call_operand.vmem [shape: f32[2,4,256], index: 7, kind: output, shape index: {}]  }
   0x1   :  { %s1066_s26 = smov 0  }
   0x2 LB: > { %s29_s27 = sadd.s32 1, %s1009_s25  ;;  %p894_p0 = scmp.ge.s32.totalorder %s1013_s26, 1  ;;  %s1013_s26 = sphi %s1066_s26, %s17_s26   ;;  %s1009_s25 = sphi %s1064_s25, %s1159_s25   ;;  %s1005_s24 = sphi %s1062_s24, %s1158_s24  }
   0x3   : > { %p31_p1 = scmp.ge.s32.totalorder %s29_s27, 2  ;;  %p273_p2 = scmp.lt.s32.totalorder %s1013_s26, 3 }
   0x5   : > { %s1161_s27 = smov (%p31_p1, %s29_s27), 0  ;;  %p274_p3 = pnand %p894_p0, %p273_p2 }
   0x6   : > { %p322_p4 = scmp.lt.s32.totalorder (!%p274_p3), %s1005_s24, 1  ;;  %s1018_s16 = smov (!%p274_p3), 112  }
   0x7   : > { %277 = sbr.rel (%p274_p3) target bundleno = 697 (0x2b9), region = 48  ;;  %s1019_s17 = smov (!%p274_p3), 96  }
   0x8   : > { %s1020_s18 = smov (!%p274_p3), 1   ;;  %s1021_s21 = smov (!%p274_p3), 127  }
   0xc   : > { %v1015_v0 = vmov 0.0   ;;  %v1016_v1 = vmov 0   ;;  %v372_v2 = vld [vmem:[%s1153_s3] sm:$0xf]  ;;  %s1163_s24 = smov (!%p322_p4, %s1005_s24), 1  ;;  %vm1017_vm0 = vmmov 0  }
   0xd   : > { %915 = vmatprep.subr.bf16.mxu1 %v1015_v0  ;;  %423 = vmatprep.mubr.bf16.mxu0 %v1016_v1  ;;  %s921_s30 = smul.u32 12, %s1163_s24  ;;  %vm364_vm1 = vcmask 1043456   ;;  %v368_v17 = vld [vmem:[%s1152_s2] sm:$0x3]  ;;  %vm378_vm2 = vcmask 64512   ;;  %vm477_vm3 = vcmask 257024  }
   0xe   : > { %917 = vmatprep.mubr.msk.bf16.mxu1 %vm1017_vm0, %v1015_v0  ;;  %953 = vset.pattern.permute.xlu0 %v1016_v1  ;;  %vm485_vm4 = vcmask 257152   ;;  %vm483_vm5 = vcmask 125952   ;;  %vm501_vm6 = vcmask 916480   ;;  %vm512_vm7 = vcmask 785408   ;;  %v902_v58 = vld [vmem:[%s1154_s4 + $0x2] sm:$0x3] }
   0xf   : > { %375 = vperm.xlu0 %953, %v372_v2   ;;  %984 = vset.pattern.permute.xlu1 %v1016_v1  ;;  %s330_s10 = scalar_lea.vmem %s1150_s0, %s921_s30  ;;  %s339_s13 = scalar_lea.vmem %s1151_s1, %s921_s30  ;;  %vm573_vm8 = vcmask 1045504   ;;  %vm569_vm9 = vcmask 97280   ;;  %v766_v60 = vld [vmem:[%s1156_s6] sm:$0xf]  ;;  %vm533_vm10 = vcmask 7168   ;;  %vm552_vm11 = vcmask 1039360  }
  0x10   : > { %v351_v3 = vld [vmem:[%s330_s10] sm:$0xff]  ;;  %v987_v7 = vld [vmem:[%s339_s13 + $0x8] ss:$0 sps:$4 sm:$0xff]   ;;  %s912_s11 = sshll.u32 %s1163_s24, 3 }
  0x11   : > { %v353_v4 = vld [vmem:[%s339_s13] sm:$0xff]  ;;  %v356_v5 = vcombine.high %v351_v3, %v351_v3  ;;  %v352_v8 = vld [vmem:[%s330_s10 + $0x8] sm:$0xf]  ;;  %s348_s14 = scalar_lea.vmem %s1157_s7, %s912_s11 }
  0x12   : > { %v360_v6 = vcombine.low %v353_v4, %v353_v4  ;;  %v367_v11 = vsel %vm364_vm1, %v352_v8, %v987_v7 }
  0x13   : > { %v366_v9 = vsel %vm364_vm1, %v356_v5, %v353_v4  ;;  %v371_v14 = vpack.c.bf16 %v367_v11, %v367_v11 }
  0x14   : > { %v365_v10 = vsel %vm364_vm1, %v351_v3, %v360_v6  ;;  %v370_v12 = vpack.c.bf16 %v366_v9, %v366_v9 }
  0x15   : > { %v369_v13 = vpack.c.bf16 %v365_v10, %v365_v10  ;;  %v389_v16 = vsel %vm364_vm1, %v371_v14, 0 }
  0x16   : > { %899 = vmatprep.subr.msk.bf16.mxu0 %vm364_vm1, %v370_v12  ;;  %916 = vmatpush3.bf16.msra.mxu1 %v389_v16 }
  0x17   : > { %v383_v15 = vsel %vm364_vm1, %v369_v13, 0 }
  0x18   : > { %406 = vmatpush1.bf16.msra.mxu0 %v383_v15 }
  0x19   : > { %918 = vmatmul.mubr.msk.bf16.vlgmr.msra.gmra.mxu1 %vm378_vm2, %v368_v17 }
  0x1a   : > { %683 = vmatprep.mubr.bf16.mxu1 %v1016_v1 }
  0x1b   : > { %900 = vmatmul.mubr.msk.bf16.vlgmr.msra.gmra.mxu0 %vm378_vm2, %v368_v17 }
  0x1c   : > { %612 = vmatprep.mubr.bf16.mxu0 %v1016_v1 }
  0x8a   : > { %v376_v18 = vpop.permute.xlu0 %375 }
  0xd9   : > { %v466_v20 = vpop.f32.mrf.mxu1 }
  0xda   : > { %v467_v21 = vadd.f32 %v466_v20, %v376_v18 }
  0xdb   : > { %v425_v19 = vpop.f32.mrf.mxu0  ;;  %v919_v23 = vpop.f32.mrf.mxu1 }
  0xdc   : > { %v426_v24 = vadd.f32 %v425_v19, %v376_v18  ;;  %478 = vst.msk [vmem:[#allocation2 + $0x8] sm:$0xf] %vm477_vm3, %v467_v21  ;;  %v568_v21 = vld [vmem:[%s1154_s4] sm:$0x3] }
  0xdd   : > { %v427_v22 = vpop.f32.mrf.mxu0  ;;  %486 = vst.msk [vmem:[#allocation2 + $0x8] sm:$0xf] %vm485_vm4, %v1015_v0  ;;  %v469_v27 = vpop.f32.mrf.mxu1 }
  0xde   : > { %v428_v25 = vadd.f32 %v427_v22, %v376_v18 }
  0xdf   : > { %v429_v26 = vpop.f32.mrf.mxu0  ;;  %v920_v30 = vpop.f32.mrf.mxu1 }
  0xe0   : > { %v474_v28 = vcombine.low %v426_v24, %v428_v25  ;;  %v907_v25 = vld [vmem:[%s1154_s4 + $0x4] sm:$0x3]  ;;  %v622_v30 = vlaneseq }
  0xe1   : > { %v430_v29 = vpop.f32.mrf.mxu0 }
  0xe2   : > { %476 = vst [vmem:[#allocation2] sm:$0xff] %v474_v28 }
  0xe3   : > { %484 = vst.msk [vmem:[#allocation2] sm:$0xf] %vm483_vm5, %v1015_v0 }
  0xe4   : > { %v488_v31 = vld [vmem:[#allocation2 + $0x8] sm:$0xf] }
  0xe5   : > { %v494_v32 = vcombine.low %v488_v31, %v488_v31 }
  0xe7   : > { %499 = vrot.lane.b32.xlu1 %v494_v32, %s1018_s16 }
  0xea   : > { %v487_v33 = vld [vmem:[#allocation2] sm:$0xff] }
  0xeb   : > { %v493_v34 = vcombine.low %v487_v33, %v487_v33  ;;  %v490_v35 = vcombine.high %v487_v33, %v487_v33 }
  0xed   : > { %v954_v36 = vpack.i.bf16 %v487_v33, %v493_v34  ;;  %v959_v37 = vpack.i.bf16 %v490_v35, %v487_v33 }
  0xef   : > { %955 = vrot.lane.b32.xlu0 %v954_v36, %s1018_s16  ;;  %960 = vrot.lane.b32.xlu1 %v959_v37, %s1019_s17 }
  0xf3   : > { %510 = vrot.lane.b32.xlu0 %v488_v31, %s1019_s17  ;;  %v623_v31 = vshrl.u32 %v622_v30, 7 }
  0xf5   : > { %v624_v32 = vsub.s32 0, %v623_v31  ;;  %v628_v34 = vsub.s32 2, %v623_v31  ;;  %v750_v37 = vsub.s32 3, %v623_v31 }
 0x159   : > { %v500_v38 = vpop.permute.xlu1 %499 }
 0x161   : > { %v956_v39 = vpop.permute.xlu0 %955  ;;  %v961_v40 = vpop.permute.xlu1 %960 }
 0x162   : > { %v958_v41 = vunpack.i.h.bf16 %v956_v39  ;;  %v957_v42 = vunpack.i.l.bf16 %v956_v39  ;;  %v963_v43 = vunpack.i.h.bf16 %v961_v40  ;;  %v962_v44 = vunpack.i.l.bf16 %v961_v40 }
 0x164   : > { %v503_v45 = vsel %vm501_vm6, %v958_v41, %v500_v38  ;;  %v502_v46 = vsel %vm501_vm6, %v957_v42, %v958_v41  ;;  %v513_v47 = vsel %vm512_vm7, %v962_v44, %v963_v43 }
 0x165   : > { %v511_v48 = vpop.permute.xlu0 %510  ;;  %v518_v49 = vsel %vm364_vm1, %v490_v35, %v503_v45  ;;  %v517_v50 = vsel %vm364_vm1, %v487_v33, %v502_v46  ;;  %v565_v33 = vld [vmem:[%s1155_s5] sm:$0xf] }
 0x166   : > { %v514_v51 = vsel %vm512_vm7, %v963_v43, %v511_v48  ;;  %v969_v52 = vpack.i.bf16 %v513_v47, %v517_v50  ;;  %v519_v53 = vpack.c.bf16 %v513_v47, %v517_v50  ;;  %v974_v59 = vpack.i.bf16 %v518_v49, %v517_v50 }
 0x167   : > { %v520_v54 = vpack.c.bf16 %v514_v51, %v518_v49  ;;  %v964_v55 = vpack.i.bf16 %v514_v51, %v518_v49  ;;  %v979_v57 = vpack.i.bf16 %v514_v51, %v513_v47  ;;  %v625_v35 = vrot.slane %v565_v33, %v624_v32 }
 0x168   : > { %970 = vrot.lane.b32.xlu0 %v969_v52, %s1020_s18  ;;  %v646_v56 = vsel %vm573_vm8, %v519_v53, 0  ;;  %v629_v36 = vrot.slane %v565_v33, %v628_v34  ;;  %v751_v43 = vrot.slane %v565_v33, %v750_v37 }
 0x169   : > { %965 = vrot.lane.b32.xlu1 %v964_v55, %s1020_s18  ;;  %905 = vmatprep.subr.msk.bf16.mxu1 %vm573_vm8, %v520_v54  ;;  %v635_v39 = vrot.slane %v625_v35, %v624_v32 }
 0x16a   : > { %666 = vmatpush1.bf16.msra.mxu1 %v646_v56  ;;  %v639_v42 = vrot.slane %v629_v36, %v624_v32 }
 0x16c   : > { %980 = vrot.lane.b32.xlu0 %v979_v57, %s1021_s21 }
 0x16d   : > { %975 = vrot.lane.b32.xlu1 %v974_v59, %s1021_s21  ;;  %906 = vmatmul.mubr.msk.bf16.vlgmr.msra.gmra.mxu1 %vm569_vm9, %v902_v58 }
 0x171   : > { %769 = vperm.xlu1 %984, %v766_v60  }
 0x1da   : > { %v971_v61 = vpop.permute.xlu0 %970 }
 0x1db   : > { %v973_v62 = vunpack.i.h.bf16 %v971_v61  ;;  %v972_v63 = vunpack.i.l.bf16 %v971_v61  ;;  %v966_v0 = vpop.permute.xlu1 %965 }
 0x1dc   : > { %v968_v2 = vunpack.i.h.bf16 %v966_v0  ;;  %v967_v3 = vunpack.i.l.bf16 %v966_v0 }
 0x1de   : > { %v535_v4 = vsel %vm533_vm10, %v973_v62, %v968_v2  ;;  %v541_v5 = vsel %vm533_vm10, %v968_v2, %v973_v62  ;;  %v534_v6 = vsel %vm533_vm10, %v972_v63, %v967_v3  ;;  %v540_v7 = vsel %vm533_vm10, %v967_v3, %v972_v63  ;;  %v981_v8 = vpop.permute.xlu0 %980 }
 0x1df   : > { %v543_v9 = vpack.c.bf16 %v535_v4, %v534_v6  ;;  %v983_v10 = vunpack.i.h.bf16 %v981_v8  ;;  %v982_v11 = vunpack.i.l.bf16 %v981_v8  ;;  %v976_v12 = vpop.permute.xlu1 %975  ;;  %v542_v13 = vpack.c.bf16 %v541_v5, %v540_v7 }
 0x1e0   : > { %v978_v14 = vunpack.i.h.bf16 %v976_v12  ;;  %v977_v15 = vunpack.i.l.bf16 %v976_v12 }
 0x1e1   : > { %v554_v16 = vsel %vm552_vm11, %v982_v11, %v983_v10  ;;  %v562_v17 = vsel %vm552_vm11, %v983_v10, %v982_v11  ;;  %903 = vmatprep.subr.msk.bf16.mxu0 %vm573_vm8, %v543_v9  ;;  %v575_v18 = vsel %vm573_vm8, %v542_v13, 0 }
 0x1e2   : > { %v553_v19 = vsel %vm552_vm11, %v977_v15, %v978_v14  ;;  %v561_v20 = vsel %vm552_vm11, %v978_v14, %v977_v15  ;;  %595 = vmatpush1.bf16.msra.mxu0 %v575_v18 }
 0x1e3   : > { %v564_v22 = vpack.c.bf16 %v562_v17, %v561_v20  ;;  %v563_v23 = vpack.c.bf16 %v554_v16, %v553_v19 }
 0x1e5   : > { %904 = vmatmul.mubr.msk.bf16.vlgmr.msra.gmra.mxu0 %vm569_vm9, %v568_v21  ;;  %908 = vmatprep.subr.msk.bf16.mxu0 %vm573_vm8, %v564_v22  ;;  %v698_v24 = vsel %vm573_vm8, %v563_v23, 0 }
 0x1e6   : > { %718 = vmatpush1.bf16.msra.mxu0 %v698_v24  ;;  %735 = vmatprep.mubr.bf16.mxu0 %v1016_v1  ;;  %v746_v1 = vsub.s32 1, %v623_v31 }
 0x1e8   : > { %v747_v40 = vrot.slane %v565_v33, %v746_v1  ;;  %v761_v49 = vrot.slane %v751_v43, %v746_v1 }
 0x1ea   : > { %v757_v46 = vrot.slane %v747_v40, %v746_v1 }
 0x1ec   : > { %v770_v57 = vpop.permute.xlu1 %769 }
 0x1ed   : > { %909 = vmatmul.mubr.msk.bf16.vlgmr.msra.gmra.mxu0 %vm569_vm9, %v907_v25 }
 0x22d   : > { %v685_v26 = vpop.f32.mrf.mxu1 }
 0x22f   : > { %v687_v27 = vpop.f32.mrf.mxu1 }
 0x231   : > { %v689_v28 = vpop.f32.mrf.mxu1 }
 0x233   : > { %v690_v29 = vpop.f32.mrf.mxu1 }
 0x2a5   : > { %v614_v38 = vpop.f32.mrf.mxu0 }
 0x2a6   : > { %v640_v45 = vmul.f32 %v635_v39, %v614_v38 }
 0x2a7   : > { %v616_v41 = vpop.f32.mrf.mxu0 }
 0x2a8   : > { %v641_v48 = vmul.f32 %v639_v42, %v616_v41  ;;  %v686_v51 = vadd.f32 %v685_v26, %v640_v45 }
 0x2a9   : > { %v618_v44 = vpop.f32.mrf.mxu0 }
 0x2aa   : > { %v688_v54 = vadd.f32 %v687_v27, %v641_v48 }
 0x2ab   : > { %v619_v47 = vpop.f32.mrf.mxu0 }
 0x2ad   : > { %v737_v50 = vpop.f32.mrf.mxu0 }
 0x2ae   : > { %v762_v52 = vmul.f32 %v757_v46, %v737_v50 }
 0x2af   : > { %v739_v53 = vpop.f32.mrf.mxu0 }
 0x2b0   : > { %v763_v55 = vmul.f32 %v761_v49, %v739_v53  ;;  %v764_v56 = vadd.f32 %v762_v52, %v686_v51 }
 0x2b1   : > { %v741_v58 = vpop.f32.mrf.mxu0 }
 0x2b2   : > { %v765_v59 = vadd.f32 %v763_v55, %v688_v54  ;;  %v772_v61 = vadd.f32 %v770_v57, %v764_v56 }
 0x2b3   : > { %v742_v60 = vpop.f32.mrf.mxu0 }
 0x2b4   : > { %v773_v62 = vadd.f32 %v770_v57, %v765_v59 }
 0x2b6   : > { %v776_v63 = vcombine.low %v772_v61, %v773_v62 }
 0x2b8   : > { %778 = vst [vmem:[%s348_s14] sm:$0xff] %v776_v63 }
 0x2b9 PF: > { %s17_s26 = sadd.s32 1, %s1013_s26   ;;  %s1158_s24 = smov %s1009_s25 }
 0x2ba   : > { %p14_p5 = scmp.ge.s32.totalorder %s17_s26, 4   ;;  %s1159_s25 = smov %s1161_s27 }
 0x2bc   :  { %16 = sbr.rel (!%p14_p5) target bundleno = 2 (0x2), region = 87 }

</bundles_post_ra>
